<compile_context>
chip_gen: v7x
topology: tpu7x:2x2x1
jax: 0.10.0
libtpu: 0.0.40
codegen_flags: <defaults>
</compile_context>

<pallas_src>
import functools

import jax
import jax.numpy as jnp
from jax.experimental import pallas as pl
from jax.experimental.pallas import tpu as pltpu

_T = 3.0
_EPS = 1e-7


def _kldiv_kernel(pred_ref, label_ref, rowsum_ref, *, n_valid,
                  use_lse_log_target):
    """One (tile_n, C) tile -> per-row KL contributions, shape (tile_n, 1)."""
    tile_n = pred_ref.shape[0]
    inv_t = jnp.float32(1.0 / _T)

    pred = pred_ref[...].astype(jnp.float32) * inv_t
    label = label_ref[...].astype(jnp.float32) * inv_t

    # predict = log_softmax(pred / T, axis=1)   (numerically stable)
    p_max = jnp.max(pred, axis=1, keepdims=True)
    p_shift = pred - p_max
    predict = p_shift - jnp.log(jnp.sum(jnp.exp(p_shift), axis=1, keepdims=True))

    # target = softmax(label / T, axis=1) + eps
    # Reciprocal-multiply instead of a full-width divide: (tile_n, 1) EUP
    # reciprocal + VPU multiply (separate VLIW slots).
    l_max = jnp.max(label, axis=1, keepdims=True)
    l_shift = label - l_max
    l_exp = jnp.exp(l_shift)
    l_sum = jnp.sum(l_exp, axis=1, keepdims=True)
    target = l_exp * pl.reciprocal(l_sum) + _EPS        # exact reciprocal

    if use_lse_log_target:
        # TODO(synk): v7x-only EUP saver (off by default) — reuses the label
        # logsumexp and ignores the +eps inside the log; error is bounded by
        # eps/target and only matters for near-zero-mass classes.
        log_target = l_shift - jnp.log(l_sum)
    else:
        log_target = jnp.log(target)

    # per-row sum of target * (log(target) - predict)
    kl = target * (log_target - predict)
    row_sum = jnp.sum(kl, axis=1, keepdims=True)         # (tile_n, 1)

    # Mask garbage rows of the (possibly ragged) last block. Must stay a
    # select (jnp.where): garbage rows can carry Inf/NaN through the softmax.
    row_idx = (pl.program_id(0) * tile_n
               + jax.lax.broadcasted_iota(jnp.int32, (tile_n, 1), 0))
    rowsum_ref[...] = jnp.where(row_idx < n_valid, row_sum, 0.0)


def _vmem_capacity_bytes():
    try:
        return int(pltpu.get_tpu_info().vmem_capacity_bytes)
    except Exception:
        return 64 * 1024 * 1024      # conservative fallback (v7x per-TC size)


def _pick_tile_n(n, c, itemsize, budget):
    """Rows per block: as large as the VMEM budget allows, >=2 blocks if n>8."""
    # Per-row working set ~= 2 inputs x 2 pipeline buffers x itemsize
    #                       + ~8 f32 C-wide temporaries (softmax intermediates).
    bytes_per_row = c * (4 * itemsize + 8 * 4)
    if 8 * bytes_per_row > budget:
        # TODO(synk): add a C-tiled / online-softmax fallback for vocab-scale C.
        raise ValueError(
            f"class dim C={c} too large for a whole-row softmax block in VMEM "
            f"(minimum 8-row block needs {8 * bytes_per_row} B > budget "
            f"{budget} B)")
    tile = (budget // bytes_per_row // 8) * 8
    n_ceil = -(-n // 8) * 8
    tile = min(tile, n_ceil)                 # never bigger than the batch
    if n > 8:
        # Keep >= 2 grid steps so v7x's two TensorCores both get work on the
        # "parallel" batch axis.
        half = ((n + 1) // 2 + 7) // 8 * 8
        tile = min(tile, half)
    return max(8, int(tile))


def kldiv_loss(pred, label, *, tile_n=None, use_lse_log_target=False):
    """pred, label: (N, C) logits (f32 or bf16). Returns scalar f32 loss."""
    assert pred.shape == label.shape and pred.ndim == 2
    n, c = pred.shape
    itemsize = max(jnp.dtype(pred.dtype).itemsize,
                   jnp.dtype(label.dtype).itemsize)

    # Generation-aware VMEM sizing: ~96 MiB limit on 128 MiB parts (v5e/v6e),
    # ~48 MiB on v7x (64 MiB per TensorCore).
    vmem_cap = _vmem_capacity_bytes()
    vmem_limit = max(32 * 1024 * 1024, int(vmem_cap * 0.75))
    budget = vmem_limit // 2

    if tile_n is None:
        tile_n = _pick_tile_n(n, c, itemsize, budget)
    assert tile_n % 8 == 0 and tile_n > 0, "tile_n must be a positive multiple of 8"

    num_tiles = pl.cdiv(n, tile_n)

    row_sums = pl.pallas_call(
        functools.partial(_kldiv_kernel, n_valid=n,
                          use_lse_log_target=use_lse_log_target),
        out_shape=jax.ShapeDtypeStruct((n, 1), jnp.float32),
        grid=(num_tiles,),
        in_specs=[
            pl.BlockSpec((tile_n, c), lambda i: (i, 0)),
            pl.BlockSpec((tile_n, c), lambda i: (i, 0)),
        ],
        out_specs=pl.BlockSpec((tile_n, 1), lambda i: (i, 0)),
        compiler_params=pltpu.CompilerParams(
            dimension_semantics=("parallel",),
            vmem_limit_bytes=vmem_limit,
        ),
    )(pred, label)

    # Scale by T^2 and divide by the FULL batch size exactly once.
    return (_T * _T) * jnp.sum(row_sums) / jnp.float32(n)


def _kldiv_reference(pred, label):
    predict = jax.nn.log_softmax(pred / _T, axis=1)
    target = jax.nn.softmax(label / _T, axis=1) + _EPS
    return _T * _T * jnp.sum(target * (jnp.log(target) - predict)) / pred.shape[0]


if __name__ == "__main__":
    key = jax.random.PRNGKey(0)
    k1, k2 = jax.random.split(key)

    # Ragged batch (12 % 8 != 0): exercises the no-pad path where the last
    # block reads OOB rows that the in-kernel select mask discards.
    n, c = 12, 64
    pred = jax.random.normal(k1, (n, c), dtype=jnp.float32)
    label = jax.random.normal(k2, (n, c), dtype=jnp.float32)

    loss = kldiv_loss(pred, label, tile_n=8)       # 2-tile pipelined grid
    jax.block_until_ready(loss)
    ref = _kldiv_reference(pred, label)
    assert jnp.allclose(loss, ref, rtol=1e-5, atol=1e-5), (loss, ref)

    # Automatic tile picker + bf16 inputs (f32 math inside the kernel).
    pred_bf = pred.astype(jnp.bfloat16)
    label_bf = label.astype(jnp.bfloat16)
    loss_bf = kldiv_loss(pred_bf, label_bf)
    jax.block_until_ready(loss_bf)
    ref_bf = _kldiv_reference(pred_bf.astype(jnp.float32),
                              label_bf.astype(jnp.float32))
    assert jnp.allclose(loss_bf, ref_bf, rtol=1e-4, atol=1e-5), (loss_bf, ref_bf)

    # Exactly-tiled batch, auto picker (2 even tiles — v7x megacore friendly).
    k3, k4 = jax.random.split(k2)
    pred2 = jax.random.normal(k3, (32, 128), dtype=jnp.float32)
    label2 = jax.random.normal(k4, (32, 128), dtype=jnp.float32)
    loss2 = kldiv_loss(pred2, label2)
    jax.block_until_ready(loss2)
    ref2 = _kldiv_reference(pred2, label2)
    assert jnp.allclose(loss2, ref2, rtol=1e-5, atol=1e-5), (loss2, ref2)

    print("KERNEL_OK")
</pallas_src>

<mosaic_0001>
module attributes {stable_mosaic.version = 11 : i64} {
  func.func @_kldiv_kernel(%arg0: i32, %arg1: memref<8x64xf32, #tpu.memory_space<vmem>>, %arg2: memref<8x64xf32, #tpu.memory_space<vmem>>, %arg3: memref<8x1xf32, #tpu.memory_space<vmem>>) attributes {dimension_semantics = [#tpu.dimension_semantics<parallel>], iteration_bounds = array<i64: 2>, scalar_prefetch = 0 : i64, scratch_operands = 0 : i64, tpu.core_type = #tpu.core_type<tc>, window_params = [{transform_indices = @transform_0, window_bounds = array<i64: 8, 64>}, {transform_indices = @transform_1, window_bounds = array<i64: 8, 64>}, {transform_indices = @transform_2, window_bounds = array<i64: 8, 1>}]} {
    %c0 = arith.constant 0 : index
    %c0_0 = arith.constant 0 : index
    %0 = vector.load %arg1[%c0, %c0_0] : memref<8x64xf32, #tpu.memory_space<vmem>>, vector<8x64xf32>
    %cst = arith.constant 0.333333343 : f32
    %1 = vector.broadcast %cst : f32 to vector<8x64xf32>
    %2 = arith.mulf %0, %1 : vector<8x64xf32>
    %c0_1 = arith.constant 0 : index
    %c0_2 = arith.constant 0 : index
    %3 = vector.load %arg2[%c0_1, %c0_2] : memref<8x64xf32, #tpu.memory_space<vmem>>, vector<8x64xf32>
    %cst_3 = arith.constant 0.333333343 : f32
    %4 = vector.broadcast %cst_3 : f32 to vector<8x64xf32>
    %5 = arith.mulf %3, %4 : vector<8x64xf32>
    %cst_4 = arith.constant dense<0xFF800000> : vector<8xf32>
    %6 = vector.multi_reduction <maximumf>, %2, %cst_4 [1] : vector<8x64xf32> to vector<8xf32>
    %7 = vector.shape_cast %6 : vector<8xf32> to vector<8x1xf32>
    %8 = vector.broadcast %7 : vector<8x1xf32> to vector<8x64xf32>
    %9 = arith.subf %2, %8 : vector<8x64xf32>
    %10 = math.exp %9 : vector<8x64xf32>
    %cst_5 = arith.constant dense<0.000000e+00> : vector<8xf32>
    %11 = vector.multi_reduction <add>, %10, %cst_5 [1] : vector<8x64xf32> to vector<8xf32>
    %12 = vector.shape_cast %11 : vector<8xf32> to vector<8x1xf32>
    %13 = math.log %12 : vector<8x1xf32>
    %14 = vector.broadcast %13 : vector<8x1xf32> to vector<8x64xf32>
    %15 = arith.subf %9, %14 : vector<8x64xf32>
    %cst_6 = arith.constant dense<0xFF800000> : vector<8xf32>
    %16 = vector.multi_reduction <maximumf>, %5, %cst_6 [1] : vector<8x64xf32> to vector<8xf32>
    %17 = vector.shape_cast %16 : vector<8xf32> to vector<8x1xf32>
    %18 = vector.broadcast %17 : vector<8x1xf32> to vector<8x64xf32>
    %19 = arith.subf %5, %18 : vector<8x64xf32>
    %20 = math.exp %19 : vector<8x64xf32>
    %cst_7 = arith.constant dense<0.000000e+00> : vector<8xf32>
    %21 = vector.multi_reduction <add>, %20, %cst_7 [1] : vector<8x64xf32> to vector<8xf32>
    %22 = vector.shape_cast %21 : vector<8xf32> to vector<8x1xf32>
    %23 = tpu.reciprocal %22 : vector<8x1xf32> -> vector<8x1xf32>
    %24 = vector.broadcast %23 : vector<8x1xf32> to vector<8x64xf32>
    %25 = arith.mulf %20, %24 : vector<8x64xf32>
    %cst_8 = arith.constant 1.000000e-07 : f32
    %26 = vector.broadcast %cst_8 : f32 to vector<8x64xf32>
    %27 = arith.addf %25, %26 : vector<8x64xf32>
    %28 = math.log %27 : vector<8x64xf32>
    %29 = arith.subf %28, %15 : vector<8x64xf32>
    %30 = arith.mulf %27, %29 : vector<8x64xf32>
    %cst_9 = arith.constant dense<0.000000e+00> : vector<8xf32>
    %31 = vector.multi_reduction <add>, %30, %cst_9 [1] : vector<8x64xf32> to vector<8xf32>
    %32 = vector.shape_cast %31 : vector<8xf32> to vector<8x1xf32>
    %c8_i32 = arith.constant 8 : i32
    %33 = arith.muli %arg0, %c8_i32 : i32
    %34 = tpu.iota {dimensions = array<i32: 0>} : vector<8x1xi32>
    %35 = vector.broadcast %33 : i32 to vector<8x1xi32>
    %36 = arith.addi %35, %34 : vector<8x1xi32>
    %c12_i32 = arith.constant 12 : i32
    %37 = vector.broadcast %c12_i32 : i32 to vector<8x1xi32>
    %38 = arith.cmpi slt, %36, %37 : vector<8x1xi32>
    %cst_10 = arith.constant 0.000000e+00 : f32
    %39 = vector.broadcast %cst_10 : f32 to vector<8x1xf32>
    %40 = arith.select %38, %32, %39 : vector<8x1xi1>, vector<8x1xf32>
    %c0_11 = arith.constant 0 : index
    %c0_12 = arith.constant 0 : index
    %41 = vector.load %arg3[%c0_11, %c0_12] : memref<8x1xf32, #tpu.memory_space<vmem>>, vector<8x1xf32>
    tpu.vector_store %arg3[%c0_11, %c0_12], %40 {strides = array<i32>} : memref<8x1xf32, #tpu.memory_space<vmem>>, vector<8x1xf32>,
    return
  }
  func.func @transform_0(%arg0: i32) -> (i32, i32) {
    %c0_i32 = arith.constant 0 : i32
    %c0_i32_0 = arith.constant 0 : i32
    return %arg0, %c0_i32 : i32, i32
  }
  func.func @transform_1(%arg0: i32) -> (i32, i32) {
    %c0_i32 = arith.constant 0 : i32
    %c0_i32_0 = arith.constant 0 : i32
    return %arg0, %c0_i32 : i32, i32
  }
  func.func @transform_2(%arg0: i32) -> (i32, i32) {
    %c0_i32 = arith.constant 0 : i32
    %c0_i32_0 = arith.constant 0 : i32
    return %arg0, %c0_i32 : i32, i32
  }
}

</mosaic_0001>

<bundles_post_ra>
// kernel: tpu_custom_call.1
= control target key start
LH: loop header
LB: loop body
LE: loop exit
PB: predicated region body
PF: predicated region fallthrough
CT: control target
= control target key end

     0   :  { %7 = vsyncpa [#allocation3], 0  ;;  %s674_s0 = inlined_call_operand.hbm [shape: f32[12,64], index: 0, kind: input, shape index: {}]   ;;  %s675_s1 = inlined_call_operand.hbm [shape: f32[12,64], index: 1, kind: input, shape index: {}]   ;;  %s676_s2 = inlined_call_operand.vmem [shape: f32[12,1], index: 2, kind: output, shape index: {}]  }
   0x1   :  { %9 = vsyncpa [#allocation3 + $0x1], 0 }
   0x2   :  { %10 = vsyncpa [#allocation5], 0 }
   0x3   :  { %12 = vsyncpa [#allocation5 + $0x1], 0  ;;  %s514_s9 = smov 0   ;;  %s516_s10 = smov 0  }
   0x4   :  { %s518_s11 = smov 0   ;;  %s520_s12 = smov 0  }
   0x5 LB: > { %s533_s13 = sadd.s32 4294967295, %s495_s12   ;;  %s536_s14 = sadd.s32 1, %s495_s12   ;;  %s495_s12 = sphi %s520_s12, %s688_s12   ;;  %s491_s11 = sphi %s518_s11, %s687_s11   ;;  %s487_s10 = sphi %s516_s10, %s686_s10   ;;  %s483_s9 = sphi %s514_s9, %s685_s9  }
   0x6   : > { %s22_s15 = ssub.s32 %s495_s12, %s536_s14  ;;  %s25_s16 = sadd.s32 1, %s491_s11 }
   0x7   : > { %p23_p0 = scmp.eq.s32.totalorder %s22_s15, 0  ;;  %p32_p1 = scmp.ne.s32.totalorder %s491_s11, %s487_s10 }
   0x8   : > { %p33_p2 = scmp.eq.s32.totalorder %s495_s12, 0  ;;  %p38_p3 = scmp.ne.s32.totalorder %s487_s10, %s483_s9 }
   0x9   : > { %s546_s17 = scalar_select %p23_p0, %s491_s11, %s25_s16  }
   0xa   : > { %p34_p4 = por %p33_p2, %p32_p1  ;;  %p39_p5 = scmp.eq.s32.totalorder %s533_s13, 0 }
   0xb   : > { %p354_p6 = scmp.lt.s32.totalorder %s495_s12, 2  ;;  %s555_s19 = sand.u32 1, %s491_s11  }
   0xc   : > { %p550_p7 = por %p39_p5, %p38_p3  ;;  %s332_s20 = sshll.u32 %s555_s19, 3 }
   0xd   : > { %s333_s21 = sshll.u32 %s495_s12, 7  ;;  %s118_s25 = scalar_lea.vmem [#allocation2], %s332_s20 }
   0xe   : > { %s678_s18 = scalar_select %p550_p7, 1, 0 }
   0xf   : > { %s564_s24 = scalar_lea.hbm %s674_s0, %s333_s21  ;;  %s125_s26 = sshll.u32 %s118_s25, 4  ;;  %s568_s26 = int_to_ptr.vmem [resolvable:$true] %s125_s26 }
  0x10   : > { %p570_p8 = pnand %p354_p6, %p34_p4  ;;  %s115_s28 = scalar_lea.sflag [#allocation3], %s555_s19 }
  0x11   : > { %s397_s29 = scalar_lea.hbm %s564_s24, 128  ;;  %s402_s4 = scalar_lea.hbm %s674_s0, 256 }
  0x12   : > { %p398_p11 = scmp.ne.s32.totalorder %s564_s24, %s397_s29  ;;  %p399_p12 = pneg %p570_p8 }
  0x13   : > { %p403_p1 = scmp.lt.u32.totalorder %s564_s24, %s674_s0  ;;  %p404_p2 = scmp.lt.u32.totalorder %s402_s4, %s397_s29 }
  0x14   : > { %p400_p13 = pnand %p399_p12, %p398_p11  ;;  %p406_p4 = scmp.lt.u32.totalorder %s397_s29, %s564_s24 }
  0x15   : > { %p405_p3 = por %p404_p2, %p403_p1 }
  0x16   : > { %p401_p0 = pneg %p400_p13 }
  0x17   : > { %p407_p5 = por %p406_p4, %p405_p3 }
  0x19   : > { %p408_p6 = pnand %p407_p5, %p401_p0 }
  0x1b   : > { %411 = shalt.err (!%p408_p6)
}
  0x1c   : > { %s412_s7 = scalar_lea.vmem %s568_s26, 128  ;;  %s497_s8 = smov [#allocation2]  }
  0x1d   : > { %p413_p11 = scmp.ne.s32.totalorder %s568_s26, %s412_s7  ;;  %s417_s9 = sshll.u32 %s497_s8, 4  ;;  %s418_s9 = int_to_ptr.vmem [resolvable:$false] %s417_s9 }
  0x1e   : > { %s419_s15 = scalar_lea.vmem %s418_s9, 256  ;;  %p420_p10 = scmp.lt.s32.totalorder %s568_s26, %s418_s9 }
  0x1f   : > { %p415_p13 = pnand %p413_p11, %p399_p12  ;;  %p421_p1 = scmp.lt.s32.totalorder %s419_s15, %s412_s7 }
  0x21   : > { %p416_p9 = pneg %p415_p13  ;;  %p422_p2 = por %p421_p1, %p420_p10 }
  0x23   : > { %p423_p3 = pnand %p422_p2, %p416_p9 }
  0x25   : > { %426 = shalt.err (!%p423_p3)
}
  0x26   : > { %350 = dma.hbm_to_vmem [thread:$0]  (!%p570_p8), %s564_s24, 128, %s568_s26, %s115_s28  }
  0x27   : > { %p680_p0 = scmp.lt.s32.totalorder %s495_s12, 3  ;;  %p681_p4 = scmp.ge.s32.totalorder %s495_s12, 1 }
  0x28   : > { %s615_s25 = scalar_lea.hbm %s675_s1, %s333_s21  ;;  %s136_s29 = scalar_lea.vmem [#allocation4], %s332_s20 }
  0x29   : > { %p606_p5 = pnand %p681_p4, %p680_p0  ;;  %s143_s30 = sshll.u32 %s136_s29, 4  ;;  %s144_s30 = int_to_ptr.vmem [resolvable:$true] %s143_s30 }
  0x2a   : > { %s133_s24 = scalar_lea.sflag [#allocation5], %s555_s19  ;;  %s427_s26 = scalar_lea.hbm %s615_s25, 128 }
  0x2b   : > { %s682_s16 = scalar_select %p606_p5, 1, 0 }
  0x2c   : > { %p428_p9 = scmp.ne.s32.totalorder %s615_s25, %s427_s26  ;;  %s432_s21 = scalar_lea.hbm %s675_s1, 256 }
  0x2d   : > { %p433_p11 = scmp.lt.u32.totalorder %s615_s25, %s675_s1  ;;  %p434_p13 = scmp.lt.u32.totalorder %s432_s21, %s427_s26 }
  0x2e   : > { %p430_p10 = pnand %p428_p9, %p399_p12  ;;  %p436_p2 = scmp.lt.u32.totalorder %s427_s26, %s615_s25 }
  0x2f   : > { %p435_p1 = por %p434_p13, %p433_p11 }
  0x30   : > { %p431_p6 = pneg %p430_p10 }
  0x31   : > { %p437_p3 = por %p436_p2, %p435_p1 }
  0x33   : > { %p438_p0 = pnand %p437_p3, %p431_p6 }
  0x35   : > { %441 = shalt.err (!%p438_p0)
}
  0x36   : > { %s442_s19 = scalar_lea.vmem %s144_s30, 128  ;;  %s498_s20 = smov [#allocation4]  }
  0x37   : > { %p443_p4 = scmp.ne.s32.totalorder %s144_s30, %s442_s19  ;;  %s447_s5 = sshll.u32 %s498_s20, 4  ;;  %s448_s5 = int_to_ptr.vmem [resolvable:$false] %s447_s5 }
  0x38   : > { %s449_s6 = scalar_lea.vmem %s448_s5, 256  ;;  %p450_p7 = scmp.lt.s32.totalorder %s144_s30, %s448_s5 }
  0x39   : > { %p445_p9 = pnand %p443_p4, %p399_p12  ;;  %p451_p5 = scmp.lt.s32.totalorder %s449_s6, %s442_s19 }
  0x3b   : > { %p446_p10 = pneg %p445_p9  ;;  %p452_p11 = por %p451_p5, %p450_p7 }
  0x3d   : > { %p453_p13 = pnand %p452_p11, %p446_p10 }
  0x3f   : > { %456 = shalt.err (!%p453_p13)
}
  0x40   : > { %353 = dma.hbm_to_vmem [thread:$0]  (!%p570_p8), %s615_s25, 128, %s144_s30, %s133_s24  }
  0x41   : > { %p683_p6 = scmp.ne.s32.totalorder %s682_s16, 0 }
  0x42   : > { %s154_s7 = sand.u32 (!%p683_p6), 1, %s487_s10   ;;  %p684_p12 = scmp.ne.s32.totalorder (!%p683_p6), %s678_s18, 0 }
  0x43   : > { %152 = sbr.rel (%p683_p6) target bundleno = 558 (0x22e), region = 28  ;;  %s337_s8 = sshll.u32 (!%p683_p6), %s154_s7, 3 }
  0x44   : > { %s155_s9 = scalar_lea.sflag (!%p683_p6), [#allocation3], %s154_s7  ;;  %s158_s15 = scalar_lea.vmem (!%p683_p6), [#allocation2], %s337_s8 }
  0x4a   : > { %474 = dma.done.wait (%p684_p12), %s155_s9, 128  }
  0x4b   : > { %476 = vsyncadd (%p684_p12), %s155_s9, 4294967168  ;;  %s164_s22 = scalar_lea.sflag [#allocation5], %s154_s7  ;;  %s167_s23 = scalar_lea.vmem [#allocation4], %s337_s8 }
  0x4c   : > { %478 = dma.done.wait (%p684_p12), %s164_s22, 128  }
  0x4d   : > { %480 = vsyncadd (%p684_p12), %s164_s22, 4294967168  ;;  %v198_v0 = vld [vmem:[%s167_s23] sm:$0xff]  ;;  %vm200_vm0 = vcmask 523264   ;;  %v196_v1 = vld [vmem:[%s158_s15] sm:$0xff]  ;;  %v233_v29 = vlaneseq  ;;  %p192_p7 = scmp.lt.s32.totalorder %s533_s13, 1  ;;  %s340_s18 = sshll.u32 %s533_s13, 3 }
  0x4e   : > { %v199_v2 = vmul.f32 0.33333334, %v198_v0  ;;  %v197_v3 = vmul.f32 0.33333334, %v196_v1  ;;  %v235_v31 = vstv %s340_s18  ;;  %vm239_vm2 = vcmask 7168  }
  0x4f   : > { %v234_v30 = vshrl.u32 %v233_v29, 7  ;;  %s690_s13 = smov (!%p192_p7, %s533_s13), 1 }
  0x50   : > { %v213_v4 = vsel %vm200_vm0, %v199_v2, -inf  ;;  %v201_v5 = vsel %vm200_vm0, %v197_v3, -inf  ;;  %s339_s27 = sshll.u32 %s690_s13, 3 }
  0x51   : > { %214 = vmax.xlane.f32.xlu0 %v213_v4  ;;  %v236_v32 = vadd.s32 %v235_v31, %v234_v30  ;;  %s195_s29 = scalar_lea.vmem %s676_s2, %s339_s27 }
  0x53   : > { %vm237_vm1 = vcmp.lt.s32.totalorder %v236_v32, 12 }
  0x55   : > { %202 = vmax.xlane.f32.xlu0 %v201_v5 }
  0xde   : > { %v215_v6 = vpop.xlane.xlu0 %214 }
  0xdf   : > { %v216_v7 = vsub.f32 %v199_v2, %v215_v6 }
  0xe1   : > { %v217_v8 = vmul.f32 1.442695, %v216_v7 }
  0xe2   : > { %v203_v9 = vpop.xlane.xlu0 %202 }
  0xe3   : > { %387 = vpow2.f32 %v217_v8  ;;  %v204_v10 = vsub.f32 %v197_v3, %v203_v9 }
  0xe5   : > { %v205_v11 = vmul.f32 1.442695, %v204_v10 }
  0xe7   : > { %389 = vpow2.f32 %v205_v11 }
  0xed   : > { %v388_v12 = vpop.eup %387 }
  0xee   : > { %v219_v13 = vsel %vm200_vm0, %v388_v12, 0.0 }
  0xef   : > { %220 = vadd.xlane.f32.xlu1 %v219_v13 }
  0xf1   : > { %v390_v14 = vpop.eup %389 }
  0xf2   : > { %v207_v15 = vsel %vm200_vm0, %v390_v14, 0.0 }
  0xf3   : > { %208 = vadd.xlane.f32.xlu1 %v207_v15 }
 0x17c   : > { %v221_v16 = vpop.xlane.xlu1 %220 }
 0x17d   : > { %391 = vrcp.f32 %v221_v16 }
 0x180   : > { %v209_v17 = vpop.xlane.xlu1 %208 }
 0x181   : > { %393 = vlog2.f32 %v209_v17 }
 0x187   : > { %v392_v18 = vpop.eup %391 }
 0x188   : > { %v223_v19 = vmul.f32 %v392_v18, %v388_v12 }
 0x18a   : > { %v224_v20 = vadd.f32 1e-07, %v223_v19 }
 0x18b   : > { %v394_v21 = vpop.eup %393 }
 0x18c   : > { %395 = vlog2.f32 %v224_v20  ;;  %v211_v22 = vmul.f32 0.6931472, %v394_v21 }
 0x18e   : > { %v212_v24 = vsub.f32 %v204_v10, %v211_v22 }
 0x196   : > { %v396_v23 = vpop.eup %395 }
 0x197   : > { %v226_v25 = vmul.f32 0.6931472, %v396_v23 }
 0x199   : > { %v227_v26 = vsub.f32 %v226_v25, %v212_v24 }
 0x19b   : > { %v228_v27 = vmul.f32 %v227_v26, %v224_v20 }
 0x19d   : > { %v229_v28 = vsel %vm200_vm0, %v228_v27, 0.0 }
 0x19e   : > { %230 = vadd.xlane.f32.xlu0 %v229_v28 }
 0x22b   : > { %v231_v33 = vpop.xlane.xlu0 %230 }
 0x22c   : > { %v238_v34 = vsel %vm237_vm1, %v231_v33, 0.0 }
 0x22d   : > { %240 = vst.msk [vmem:[%s195_s29] sm:$0xff] %vm239_vm2, %v238_v34 }
 0x22e PF: > { %p15_p8 = scmp.ge.s32.totalorder %s536_s14, 4   ;;  %s685_s9 = smov %s487_s10 }
 0x22f   : > { %s686_s10 = smov %s491_s11  ;;  %s687_s11 = smov %s546_s17 }
 0x230   : > { %s688_s12 = smov %s536_s14  ;;  %17 = sbr.rel (!%p15_p8) target bundleno = 5 (0x5), region = 81 }
 0x237   :  { %260 = vsyncpa [#allocation3], 1 }
 0x238   :  { %262 = vsyncpa [#allocation3 + $0x1], 1 }
 0x239   :  { %263 = vsyncpa [#allocation5], 1 }
 0x23a   :  { %265 = vsyncpa [#allocation5 + $0x1], 1 }

</bundles_post_ra>
